<compile_context>
chip_gen: v6e
topology: v6e:2x2x1
jax: 0.10.0
libtpu: 0.0.40
codegen_flags: <defaults>
</compile_context>

<pallas_src>
import functools

import jax
import jax.numpy as jnp
from jax.experimental import pallas as pl
from jax.experimental.pallas import tpu as pltpu


def _round_up(x, m):
    return ((x + m - 1) // m) * m


def _pick_tn(emb_dim_p, max_tn=512):
    """Lane-dense N tile for the second matmul that divides emb_dim_p."""
    if emb_dim_p <= max_tn:
        return emb_dim_p
    for cand in (512, 384, 256, 128):
        if emb_dim_p % cand == 0:
            return cand
    return 128  # emb_dim_p is a multiple of 128, so this always divides


def _task_encoder_kernel(x_ref, w1_ref, b1_ref, w2_ref, b2_ref, o_ref, h_ref):
    # Grid = (batch tiles [parallel], N tiles of 2nd matmul [arbitrary]).
    # x_ref:  (block_b, task_dim_p)
    # w1_ref: (task_dim_p, emb_dim_p)   b1_ref: (1, emb_dim_p)
    # w2_ref: (emb_dim_p, tn)           b2_ref: (1, tn)
    # o_ref:  (block_b, tn)
    # h_ref:  (block_b, emb_dim_p) f32 scratch, persists across the N axis.
    n = pl.program_id(1)

    @pl.when(n == 0)
    def _():
        h = jnp.dot(x_ref[...], w1_ref[...], preferred_element_type=jnp.float32)
        h_ref[...] = jnp.maximum(h + b1_ref[...], 0.0)  # bias + ReLU in f32

    y = jnp.dot(h_ref[...].astype(w2_ref.dtype), w2_ref[...],
                preferred_element_type=jnp.float32) + b2_ref[...]
    o_ref[...] = y.astype(o_ref.dtype)


@functools.partial(jax.jit, static_argnames=("block_b", "block_n"))
def task_encoder(task, w1, b1, w2, b2, *, block_b=None, block_n=None):
    """Fused MLP: relu(task @ w1 + b1) @ w2 + b2.

    task: (B, task_dim)
    w1:   (task_dim, emb_dim)   b1: (emb_dim,)     (weights transposed vs. PyTorch)
    w2:   (emb_dim, emb_dim)    b2: (emb_dim,)
    """
    B, task_dim = task.shape
    emb_dim = w1.shape[1]
    dtype = task.dtype
    itemsize = jnp.dtype(dtype).itemsize

    # Lane-dense (multiple-of-128) feature dims.
    task_dim_p = _round_up(task_dim, 128)
    emb_dim_p = _round_up(emb_dim, 128)

    # Batch tile: large enough to amortize per-grid-step overhead, bounded for
    # VMEM, multiple of 8 (sublane) / 128-friendly on all TPU generations.
    if block_b is None:
        block_b = min(512, _round_up(B, 8))
    block_b = max(8, _round_up(block_b, 8))
    Bp = _round_up(B, block_b)

    # N tile of the second matmul (w2 streamed in (emb_dim_p, tn) slabs).
    tn = block_n if block_n is not None else _pick_tn(emb_dim_p)

    # Zero-pad once at the wrapper level (zeros are exact for Linear + ReLU:
    # padded input cols hit zero weight rows, padded hidden cols stay zero).
    x_p = jnp.pad(task, ((0, Bp - B), (0, task_dim_p - task_dim)))
    w1_p = jnp.pad(w1, ((0, task_dim_p - task_dim), (0, emb_dim_p - emb_dim)))
    b1_p = jnp.pad(b1, (0, emb_dim_p - emb_dim)).reshape(1, emb_dim_p)
    w2_p = jnp.pad(w2, ((0, emb_dim_p - emb_dim), (0, emb_dim_p - emb_dim)))
    b2_p = jnp.pad(b2, (0, emb_dim_p - emb_dim)).reshape(1, emb_dim_p)

    grid = (Bp // block_b, emb_dim_p // tn)

    # Explicit VMEM budget: double-buffered operands + resident h scratch,
    # with 25% headroom, capped at 64 MiB (v7x physical VMEM).
    f32 = 4
    vmem_needed = 2 * (block_b * task_dim_p        # x tiles
                       + task_dim_p * emb_dim_p    # w1 (resident)
                       + 8 * emb_dim_p             # b1
                       + emb_dim_p * tn            # w2 slab
                       + 8 * tn                    # b2 slab
                       + block_b * tn)             # output tiles
    vmem_needed = (vmem_needed + block_b * emb_dim_p) * f32
    vmem_limit = int(min(max(vmem_needed * 5 // 4, 8 * 2**20), 64 * 2**20))

    cost = pl.CostEstimate(
        flops=2 * B * emb_dim * (task_dim + emb_dim),
        transcendentals=0,
        bytes_accessed=(B * task_dim + task_dim * emb_dim + emb_dim
                        + emb_dim * emb_dim + emb_dim + B * emb_dim) * itemsize,
    )

    out_p = pl.pallas_call(
        _task_encoder_kernel,
        out_shape=jax.ShapeDtypeStruct((Bp, emb_dim_p), dtype),
        grid_spec=pltpu.PrefetchScalarGridSpec(
            num_scalar_prefetch=0,
            grid=grid,
            in_specs=[
                # Batch-tiled activations (re-used across the N axis).
                pl.BlockSpec((block_b, task_dim_p), lambda i, n: (i, 0)),
                # Loop-invariant w1/b1: constant index_map => DMA'd once.
                # TODO(synk): pipeline_mode=pl.Buffered(1) would halve their
                # VMEM footprint; left default-buffered for portability.
                pl.BlockSpec((task_dim_p, emb_dim_p), lambda i, n: (0, 0)),
                pl.BlockSpec((1, emb_dim_p), lambda i, n: (0, 0)),
                # w2/b2 streamed by N tile.
                pl.BlockSpec((emb_dim_p, tn), lambda i, n: (0, n)),
                pl.BlockSpec((1, tn), lambda i, n: (0, n)),
            ],
            out_specs=pl.BlockSpec((block_b, tn), lambda i, n: (i, n)),
            scratch_shapes=[pltpu.VMEM((block_b, emb_dim_p), jnp.float32)],
        ),
        compiler_params=pltpu.CompilerParams(
            dimension_semantics=("parallel", "arbitrary"),
            vmem_limit_bytes=vmem_limit,
        ),
        cost_estimate=cost,
    )(x_p, w1_p, b1_p, w2_p, b2_p)

    return out_p[:B, :emb_dim]


def init_params(key, task_dim, emb_dim, dtype=jnp.float32):
    """Deterministic init mimicking nn.Linear default: U(-1/sqrt(fan_in), +1/sqrt(fan_in))."""
    k1, k2, k3, k4 = jax.random.split(key, 4)
    bound1 = 1.0 / (task_dim ** 0.5)
    bound2 = 1.0 / (emb_dim ** 0.5)
    w1 = jax.random.uniform(k1, (task_dim, emb_dim), dtype, -bound1, bound1)
    b1 = jax.random.uniform(k2, (emb_dim,), dtype, -bound1, bound1)
    w2 = jax.random.uniform(k3, (emb_dim, emb_dim), dtype, -bound2, bound2)
    b2 = jax.random.uniform(k4, (emb_dim,), dtype, -bound2, bound2)
    return w1, b1, w2, b2


def task_encoder_ref(task, w1, b1, w2, b2):
    h = jnp.maximum(task @ w1 + b1, 0.0)
    return h @ w2 + b2


if __name__ == "__main__":
    key = jax.random.PRNGKey(0)
    k_x, k_p = jax.random.split(key)

    batch, task_dim, emb_dim = 8, 16, 32
    task = jax.random.normal(k_x, (batch, task_dim), jnp.float32)
    w1, b1, w2, b2 = init_params(k_p, task_dim, emb_dim)

    out = task_encoder(task, w1, b1, w2, b2)
    out = jax.block_until_ready(out)

    ref = task_encoder_ref(task, w1, b1, w2, b2)
    assert out.shape == (batch, emb_dim)
    assert jnp.allclose(out, ref, atol=1e-5, rtol=1e-5), "mismatch vs reference"

    print("KERNEL_OK")
</pallas_src>

<mosaic_0001>
module attributes {stable_mosaic.version = 11 : i64} {
  func.func @_task_encoder_kernel(%arg0: i32, %arg1: i32, %arg2: memref<8x128xf32, #tpu.memory_space<vmem>>, %arg3: memref<128x128xf32, #tpu.memory_space<vmem>>, %arg4: memref<1x128xf32, #tpu.memory_space<vmem>>, %arg5: memref<128x128xf32, #tpu.memory_space<vmem>>, %arg6: memref<1x128xf32, #tpu.memory_space<vmem>>, %arg7: memref<8x128xf32, #tpu.memory_space<vmem>>, %arg8: memref<8x128xf32, #tpu.memory_space<vmem>>) attributes {dimension_semantics = [#tpu.dimension_semantics<parallel>, #tpu.dimension_semantics<arbitrary>], iteration_bounds = array<i64: 1, 1>, scalar_prefetch = 0 : i64, scratch_operands = 1 : i64, tpu.core_type = #tpu.core_type<tc>, window_params = [{transform_indices = @transform_0, window_bounds = array<i64: 8, 128>}, {pipeline_mode = #tpu.pipeline_mode<synchronous>, transform_indices = @transform_1, window_bounds = array<i64: 128, 128>}, {pipeline_mode = #tpu.pipeline_mode<synchronous>, transform_indices = @transform_2, window_bounds = array<i64: 1, 128>}, {transform_indices = @transform_3, window_bounds = array<i64: 128, 128>}, {transform_indices = @transform_4, window_bounds = array<i64: 1, 128>}, {transform_indices = @transform_5, window_bounds = array<i64: 8, 128>}]} {
    %c0_i32 = arith.constant 0 : i32
    %0 = arith.cmpi eq, %arg1, %c0_i32 : i32
    %1 = arith.extui %0 : i1 to i32
    %c0_i32_0 = arith.constant 0 : i32
    %2 = arith.cmpi ne, %1, %c0_i32_0 : i32
    scf.if %2 {
      %c0_8 = arith.constant 0 : index
      %c0_9 = arith.constant 0 : index
      %10 = vector.load %arg2[%c0_8, %c0_9] : memref<8x128xf32, #tpu.memory_space<vmem>>, vector<8x128xf32>
      %c0_10 = arith.constant 0 : index
      %c0_11 = arith.constant 0 : index
      %11 = vector.load %arg3[%c0_10, %c0_11] : memref<128x128xf32, #tpu.memory_space<vmem>>, vector<128x128xf32>
      %cst_12 = arith.constant dense<0.000000e+00> : vector<8x128xf32>
      %12 = tpu.matmul %10, %11, %cst_12 {dimension_numbers = #tpu.dot_dimension_numbers<[1], [0], [0], [1], [0, 0, 1, 1], [], []>} : vector<8x128xf32>, vector<128x128xf32>, vector<8x128xf32> -> vector<8x128xf32>
      %c0_13 = arith.constant 0 : index
      %c0_14 = arith.constant 0 : index
      %13 = vector.load %arg4[%c0_13, %c0_14] : memref<1x128xf32, #tpu.memory_space<vmem>>, vector<1x128xf32>
      %14 = vector.broadcast %13 : vector<1x128xf32> to vector<8x128xf32>
      %15 = arith.addf %12, %14 : vector<8x128xf32>
      %cst_15 = arith.constant 0.000000e+00 : f32
      %16 = vector.broadcast %cst_15 : f32 to vector<8x128xf32>
      %17 = arith.maximumf %15, %16 : vector<8x128xf32>
      %c0_16 = arith.constant 0 : index
      %c0_17 = arith.constant 0 : index
      %18 = vector.load %arg8[%c0_16, %c0_17] : memref<8x128xf32, #tpu.memory_space<vmem>>, vector<8x128xf32>
      tpu.vector_store %arg8[%c0_16, %c0_17], %17 {strides = array<i32>} : memref<8x128xf32, #tpu.memory_space<vmem>>, vector<8x128xf32>,
    } else {
    }
    %c0 = arith.constant 0 : index
    %c0_1 = arith.constant 0 : index
    %3 = vector.load %arg8[%c0, %c0_1] : memref<8x128xf32, #tpu.memory_space<vmem>>, vector<8x128xf32>
    %c0_2 = arith.constant 0 : index
    %c0_3 = arith.constant 0 : index
    %4 = vector.load %arg5[%c0_2, %c0_3] : memref<128x128xf32, #tpu.memory_space<vmem>>, vector<128x128xf32>
    %cst = arith.constant dense<0.000000e+00> : vector<8x128xf32>
    %5 = tpu.matmul %3, %4, %cst {dimension_numbers = #tpu.dot_dimension_numbers<[1], [0], [0], [1], [0, 0, 1, 1], [], []>} : vector<8x128xf32>, vector<128x128xf32>, vector<8x128xf32> -> vector<8x128xf32>
    %c0_4 = arith.constant 0 : index
    %c0_5 = arith.constant 0 : index
    %6 = vector.load %arg6[%c0_4, %c0_5] : memref<1x128xf32, #tpu.memory_space<vmem>>, vector<1x128xf32>
    %7 = vector.broadcast %6 : vector<1x128xf32> to vector<8x128xf32>
    %8 = arith.addf %5, %7 : vector<8x128xf32>
    %c0_6 = arith.constant 0 : index
    %c0_7 = arith.constant 0 : index
    %9 = vector.load %arg7[%c0_6, %c0_7] : memref<8x128xf32, #tpu.memory_space<vmem>>, vector<8x128xf32>
    tpu.vector_store %arg7[%c0_6, %c0_7], %8 {strides = array<i32>} : memref<8x128xf32, #tpu.memory_space<vmem>>, vector<8x128xf32>,
    return
  }
  func.func @transform_0(%arg0: i32, %arg1: i32) -> (i32, i32) {
    %c0_i32 = arith.constant 0 : i32
    %c0_i32_0 = arith.constant 0 : i32
    return %arg0, %c0_i32 : i32, i32
  }
  func.func @transform_1(%arg0: i32, %arg1: i32) -> (i32, i32) {
    %c0_i32 = arith.constant 0 : i32
    %c0_i32_0 = arith.constant 0 : i32
    %c0_i32_1 = arith.constant 0 : i32
    return %c0_i32, %c0_i32_0 : i32, i32
  }
  func.func @transform_2(%arg0: i32, %arg1: i32) -> (i32, i32) {
    %c0_i32 = arith.constant 0 : i32
    %c0_i32_0 = arith.constant 0 : i32
    %c0_i32_1 = arith.constant 0 : i32
    return %c0_i32, %c0_i32_0 : i32, i32
  }
  func.func @transform_3(%arg0: i32, %arg1: i32) -> (i32, i32) {
    %c0_i32 = arith.constant 0 : i32
    %c0_i32_0 = arith.constant 0 : i32
    return %c0_i32, %arg1 : i32, i32
  }
  func.func @transform_4(%arg0: i32, %arg1: i32) -> (i32, i32) {
    %c0_i32 = arith.constant 0 : i32
    %c0_i32_0 = arith.constant 0 : i32
    return %c0_i32, %arg1 : i32, i32
  }
  func.func @transform_5(%arg0: i32, %arg1: i32) -> (i32, i32) {
    %c0_i32 = arith.constant 0 : i32
    return %arg0, %arg1 : i32, i32
  }
}

</mosaic_0001>

<bundles_post_ra>
// kernel: task_encoder.1
= control target key start
LH: loop header
LB: loop body
LE: loop exit
PB: predicated region body
PF: predicated region fallthrough
CT: control target
= control target key end

     0   :  { %v361_v1 = vmov 0.0   ;;  %vm362_vm0 = vmmov 0   ;;  %s536_s0 = inlined_call_operand.vmem [shape: f32[8,128], index: 0, kind: input, shape index: {}]   ;;  %s537_s1 = inlined_call_operand.vmem [shape: f32[128,128], index: 1, kind: input, shape index: {}]   ;;  %s538_s2 = inlined_call_operand.vmem [shape: f32[1,128], index: 2, kind: input, shape index: {}]   ;;  %s539_s3 = inlined_call_operand.vmem [shape: f32[128,128], index: 3, kind: input, shape index: {}]   ;;  %s540_s4 = inlined_call_operand.vmem [shape: f32[1,128], index: 4, kind: input, shape index: {}]   ;;  %s541_s5 = inlined_call_operand.hbm [shape: f32[8,128], index: 5, kind: output, shape index: {}]  }
   0x1   :  { %v41_v0 = vld [vmem:[%s537_s1 + $0x78] sm:$0xff]  ;;  %266 = vmatprep.subr.mxu0 %v361_v1  ;;  %v40_v2 = vld [vmem:[%s537_s1 + $0x70] sm:$0xff]  ;;  %298 = vmatprep.mubr.msk.f32.mxu0 %vm362_vm0, %v361_v1  ;;  %v39_v3 = vld [vmem:[%s537_s1 + $0x68] sm:$0xff] }
   0x2   :  { %267 = vmatpush3.msra.mxu0 %v41_v0  ;;  %301 = vmatprep.subr.mxu1 %v361_v1  ;;  %v38_v4 = vld [vmem:[%s537_s1 + $0x60] sm:$0xff]  ;;  %v137_v5 = vld [vmem:[%s539_s3 + $0x78] sm:$0xff]  ;;  %v136_v6 = vld [vmem:[%s539_s3 + $0x70] sm:$0xff] }
   0x3   :  { %268 = vmatprep.subr.mxu0 %v361_v1  ;;  %333 = vmatprep.mubr.msk.f32.mxu1 %vm362_vm0, %v361_v1  ;;  %v37_v7 = vld [vmem:[%s537_s1 + $0x58] sm:$0xff]  ;;  %v135_v8 = vld [vmem:[%s539_s3 + $0x68] sm:$0xff]  ;;  %v36_v9 = vld [vmem:[%s537_s1 + $0x50] sm:$0xff] }
   0x4   :  { %269 = vmatpush3.msra.mxu0 %v40_v2  ;;  %302 = vmatpush3.msra.mxu1 %v137_v5  ;;  %v134_v10 = vld [vmem:[%s539_s3 + $0x60] sm:$0xff] }
   0x5   :  { %270 = vmatprep.subr.mxu0 %v361_v1  ;;  %303 = vmatprep.subr.mxu1 %v361_v1 }
   0x6   :  { %271 = vmatpush3.msra.mxu0 %v39_v3  ;;  %304 = vmatpush3.msra.mxu1 %v136_v6 }
   0x7   :  { %272 = vmatprep.subr.mxu0 %v361_v1  ;;  %305 = vmatprep.subr.mxu1 %v361_v1 }
   0x8   :  { %273 = vmatpush3.msra.mxu0 %v38_v4  ;;  %306 = vmatpush3.msra.mxu1 %v135_v8 }
   0x9   :  { %274 = vmatprep.subr.mxu0 %v361_v1 }
   0xa   :  { %275 = vmatpush3.msra.mxu0 %v37_v7 }
   0xb   :  { %10 = vsyncpa [#allocation4], 0  ;;  %276 = vmatprep.subr.mxu0 %v361_v1  ;;  %v35_v11 = vld [vmem:[%s537_s1 + $0x48] sm:$0xff]  ;;  %307 = vmatprep.subr.mxu1 %v361_v1  ;;  %v133_v12 = vld [vmem:[%s539_s3 + $0x58] sm:$0xff]  ;;  %s363_s11 = smov [#allocation3]  }
   0xc   :  { %277 = vmatpush3.msra.mxu0 %v36_v9  ;;  %308 = vmatpush3.msra.mxu1 %v134_v10  ;;  %v34_v13 = vld [vmem:[%s537_s1 + $0x40] sm:$0xff]  ;;  %v132_v14 = vld [vmem:[%s539_s3 + $0x50] sm:$0xff]  ;;  %v33_v15 = vld [vmem:[%s537_s1 + $0x38] sm:$0xff]  ;;  %s222_s12 = sshll.u32 %s363_s11, 4  ;;  %s223_s12 = int_to_ptr.vmem [resolvable:$true] %s222_s12 }
   0xd   :  { %278 = vmatprep.subr.mxu0 %v361_v1  ;;  %309 = vmatprep.subr.mxu1 %v361_v1  ;;  %v131_v16 = vld [vmem:[%s539_s3 + $0x48] sm:$0xff]  ;;  %v32_v17 = vld [vmem:[%s537_s1 + $0x30] sm:$0xff]  ;;  %v130_v18 = vld [vmem:[%s539_s3 + $0x40] sm:$0xff]  ;;  %p344_p1 = scmp.lt.s32.totalorder %s223_s12, %s223_s12 }
   0xe   :  { %279 = vmatpush3.msra.mxu0 %v35_v11  ;;  %310 = vmatpush3.msra.mxu1 %v133_v12  ;;  %v31_v19 = vld [vmem:[%s537_s1 + $0x28] sm:$0xff]  ;;  %v129_v20 = vld [vmem:[%s539_s3 + $0x38] sm:$0xff]  ;;  %v30_v21 = vld [vmem:[%s537_s1 + $0x20] sm:$0xff] }
   0xf   :  { %280 = vmatprep.subr.mxu0 %v361_v1  ;;  %311 = vmatprep.subr.mxu1 %v361_v1  ;;  %v128_v22 = vld [vmem:[%s539_s3 + $0x30] sm:$0xff]  ;;  %v29_v23 = vld [vmem:[%s537_s1 + $0x18] sm:$0xff]  ;;  %v127_v24 = vld [vmem:[%s539_s3 + $0x28] sm:$0xff] }
  0x10   :  { %281 = vmatpush3.msra.mxu0 %v34_v13  ;;  %312 = vmatpush3.msra.mxu1 %v132_v14  ;;  %v28_v25 = vld [vmem:[%s537_s1 + $0x10] sm:$0xff]  ;;  %v126_v26 = vld [vmem:[%s539_s3 + $0x20] sm:$0xff]  ;;  %v27_v27 = vld [vmem:[%s537_s1 + $0x8] sm:$0xff] }
  0x11   :  { %282 = vmatprep.subr.mxu0 %v361_v1  ;;  %313 = vmatprep.subr.mxu1 %v361_v1  ;;  %v125_v28 = vld [vmem:[%s539_s3 + $0x18] sm:$0xff]  ;;  %v26_v29 = vld [vmem:[%s537_s1] sm:$0xff]  ;;  %v124_v31 = vld [vmem:[%s539_s3 + $0x10] sm:$0xff] }
  0x12   :  { %283 = vmatpush3.msra.mxu0 %v33_v15  ;;  %314 = vmatpush3.msra.mxu1 %v131_v16  ;;  %v25_v30 = vld [vmem:[%s536_s0] sm:$0xff]  ;;  %v123_v32 = vld [vmem:[%s539_s3 + $0x8] sm:$0xff] }
  0x13   :  { %284 = vmatprep.subr.mxu0 %v361_v1  ;;  %315 = vmatprep.subr.mxu1 %v361_v1  ;;  %v122_v33 = vld [vmem:[%s539_s3] sm:$0xff]  ;;  %s339_s3 = scalar_lea.vmem %s223_s12, 128 }
  0x14   :  { %285 = vmatpush3.msra.mxu0 %v32_v17  ;;  %316 = vmatpush3.msra.mxu1 %v130_v18  ;;  %v230_v34 = vld [vmem:[%s538_s2] ss:$0 sm:$0xff]  ;;  %p340_p0 = scmp.ne.s32.totalorder %s223_s12, %s339_s3  ;;  %p345_p2 = scmp.lt.s32.totalorder %s339_s3, %s339_s3 }
  0x15   :  { %286 = vmatprep.subr.mxu0 %v361_v1  ;;  %317 = vmatprep.subr.mxu1 %v361_v1  ;;  %v231_v39 = vld [vmem:[%s540_s4] ss:$0 sm:$0xff] }
  0x16   :  { %287 = vmatpush3.msra.mxu0 %v31_v19  ;;  %318 = vmatpush3.msra.mxu1 %v129_v20  ;;  %p346_p3 = por %p345_p2, %p344_p1 }
  0x17   :  { %288 = vmatprep.subr.mxu0 %v361_v1  ;;  %319 = vmatprep.subr.mxu1 %v361_v1 }
  0x18   :  { %289 = vmatpush3.msra.mxu0 %v30_v21  ;;  %320 = vmatpush3.msra.mxu1 %v128_v22  ;;  %p347_p4 = pnand %p346_p3, %p340_p0 }
  0x19   :  { %290 = vmatprep.subr.mxu0 %v361_v1  ;;  %321 = vmatprep.subr.mxu1 %v361_v1 }
  0x1a   :  { %291 = vmatpush3.msra.mxu0 %v29_v23  ;;  %322 = vmatpush3.msra.mxu1 %v127_v24 }
  0x1b   :  { %292 = vmatprep.subr.mxu0 %v361_v1  ;;  %323 = vmatprep.subr.mxu1 %v361_v1 }
  0x1c   :  { %293 = vmatpush3.msra.mxu0 %v28_v25  ;;  %324 = vmatpush3.msra.mxu1 %v126_v26 }
  0x1d   :  { %294 = vmatprep.subr.mxu0 %v361_v1  ;;  %325 = vmatprep.subr.mxu1 %v361_v1 }
  0x1e   :  { %295 = vmatpush3.msra.mxu0 %v27_v27  ;;  %326 = vmatpush3.msra.mxu1 %v125_v28 }
  0x1f   :  { %296 = vmatprep.subr.mxu0 %v361_v1  ;;  %327 = vmatprep.subr.mxu1 %v361_v1 }
  0x20   :  { %297 = vmatpush3.msra.mxu0 %v26_v29  ;;  %328 = vmatpush3.msra.mxu1 %v124_v31 }
  0x21   :  { %299 = vmatmul.mubr.f32.vlgmr.msra.gmra.mxu0 %v25_v30  ;;  %329 = vmatprep.subr.mxu1 %v361_v1 }
  0x22   :  { %330 = vmatpush3.msra.mxu1 %v123_v32 }
  0x23   :  { %331 = vmatprep.subr.mxu1 %v361_v1 }
  0x24   :  { %332 = vmatpush3.msra.mxu1 %v122_v33 }
  0xe1   :  { %v115_v35 = vpop.f32.mrf.mxu0 }
  0xe2   :  { %v116_v36 = vadd.f32 %v230_v34, %v115_v35 }
  0xe3   :  { %v300_v37 = vpop.f32.mrf.mxu0 }
  0xe4   :  { %v119_v38 = vmax.f32 %v116_v36, 0.0 }
  0xe6   :  { %334 = vmatmul.mubr.f32.vlgmr.msra.gmra.mxu1 %v119_v38 }
 0x1a6   :  { %v211_v40 = vpop.f32.mrf.mxu1 }
 0x1a7   :  { %v212_v41 = vadd.f32 %v231_v39, %v211_v40 }
 0x1a8   :  { %v335_v42 = vpop.f32.mrf.mxu1 }
 0x1a9   :  { %215 = vst [vmem:[#allocation3] sm:$0xff] %v212_v41 }
 0x1aa   :  { %350 = shalt.err (!%p347_p4)
}
 0x1ab   :  { %225 = dma.vmem_to_hbm [thread:$0]  %s223_s12, 128, %s541_s5, [#allocation4]  }
 0x1ac   :  { %359 = dma.done.wait [#allocation4], 128  }
 0x1ad   :  { %360 = vsyncadd [#allocation4], 4294967168 }
 0x1ae   :  { %229 = vsyncpa [#allocation4], 1 }

</bundles_post_ra>
